<compile_context>
chip_gen: v6e
topology: v6e:2x2x1
jax: 0.10.0
libtpu: 0.0.40
codegen_flags: <defaults>
</compile_context>

<pallas_src>
import math
import jax
import jax.numpy as jnp
from jax import lax
from jax.experimental import pallas as pl
from jax.experimental.pallas import tpu as pltpu

# Hard-concrete constants (from the L0 regularization paper / sparse.l0_layers)
LIMIT_A = -0.1
LIMIT_B = 1.1
EPS = 1e-6               # unused on the eval path (kept for parity with the module)
TEMPERATURE = 2.0 / 3.0
DROPRATE_INIT = 0.5


def _round_up(x: int, m: int) -> int:
    return ((x + m - 1) // m) * m


def l0_linear_kernel(x_ref, w_ref, la_ref, b_ref, o_ref, acc_ref):
    """Fused: per-K-slice gate + gated activation + MXU matmul + bias.

    Block shapes:
      x_ref   : (tm, tk)      activations tile
      w_ref   : (tn, tk)      weight tile, torch layout (out, in)
      la_ref  : (1, tk)       log-alpha slice for this K tile
      b_ref   : (1, tn)       bias tile
      o_ref   : (tm, tn)      output tile (resident across the K axis)
      acc_ref : (tm, tn) f32  accumulator scratch
    """
    k = pl.program_id(2)

    @pl.when(k == 0)
    def _():
        acc_ref[...] = jnp.zeros_like(acc_ref)

    # Median of the stretched concrete distribution (evaluation_gates),
    # computed only for the current K slice.  sigmoid -> EUP slot.
    z = jax.nn.sigmoid(la_ref[...] * (1.0 / TEMPERATURE))        # (1, tk)
    z = jnp.clip(z * (LIMIT_B - LIMIT_A) + LIMIT_A, 0.0, 1.0)

    # Gate the activations (cheaper than gating W; mathematically identical).
    x_gated = x_ref[...] * z                                     # (tm, tk)

    # Contract over the last (lane) dim of both operands -> no transpose.
    acc_ref[...] += lax.dot_general(
        x_gated, w_ref[...],
        dimension_numbers=(((1,), (1,)), ((), ())),
        preferred_element_type=jnp.float32)                      # (tm, tn)

    @pl.when(k == pl.num_programs(2) - 1)
    def _():
        o_ref[...] = (acc_ref[...] + b_ref[...]).astype(o_ref.dtype)


def l0_linear_forward(x, weight, weight_log_alpha, bias,
                      *, tm=None, tn=None, tk=None):
    """x: (B, in), weight: (out, in), weight_log_alpha: (in,), bias: (out,)."""
    B, in_features = x.shape
    out_features = weight.shape[0]

    # Pad to lane/sublane-friendly sizes.  Zero padding is exact:
    #   * padded x columns are 0  -> no contribution regardless of gate value,
    #   * padded W rows/cols are 0 -> padded output columns are 0 + bias_pad(=0),
    #   * the padded output region is sliced off before returning.
    B_p = _round_up(B, 8)
    K_p = _round_up(in_features, 128)
    N_p = _round_up(out_features, 128)

    # Tile sizes: lane-dense 128-aligned output, capped so
    # 2*(tm*tk + tn*tk) + tm*tn f32 double-buffered stays well under the
    # scoped-VMEM default on every generation (v7x has only 64 MiB physical).
    if tm is None:
        tm = min(B_p, 256)
    if tn is None:
        tn = min(N_p, 512)
    if tk is None:
        tk = min(K_p, 512)

    x_p = jnp.zeros((B_p, K_p), jnp.float32).at[:B, :in_features].set(x)
    w_p = jnp.zeros((N_p, K_p), jnp.float32).at[:out_features, :in_features].set(weight)
    la_p = jnp.zeros((1, K_p), jnp.float32).at[0, :in_features].set(weight_log_alpha)
    b_p = jnp.zeros((1, N_p), jnp.float32).at[0, :out_features].set(bias)

    grid = (B_p // tm, N_p // tn, K_p // tk)

    out_p = pl.pallas_call(
        l0_linear_kernel,
        out_shape=jax.ShapeDtypeStruct((B_p, N_p), jnp.float32),
        grid_spec=pltpu.PrefetchScalarGridSpec(
            num_scalar_prefetch=0,
            grid=grid,
            in_specs=[
                pl.BlockSpec((tm, tk), lambda i, j, k: (i, k)),   # x
                pl.BlockSpec((tn, tk), lambda i, j, k: (j, k)),   # W (out, in)
                pl.BlockSpec((1, tk), lambda i, j, k: (0, k)),    # log_alpha slice
                pl.BlockSpec((1, tn), lambda i, j, k: (0, j)),    # bias tile
            ],
            out_specs=pl.BlockSpec((tm, tn), lambda i, j, k: (i, j)),
            scratch_shapes=[pltpu.VMEM((tm, tn), jnp.float32)],
        ),
        compiler_params=pltpu.CompilerParams(
            dimension_semantics=("parallel", "parallel", "arbitrary")),
    )(x_p, w_p, la_p, b_p)

    return out_p[:B, :out_features]


def reference_forward(x, weight, weight_log_alpha, bias):
    """Plain-JAX reference of the same eval-mode forward."""
    z = jax.nn.sigmoid(weight_log_alpha / TEMPERATURE) * (LIMIT_B - LIMIT_A) + LIMIT_A
    z = jnp.clip(z, 0.0, 1.0)
    w_gated = weight * z[None, :]
    return x @ w_gated.T + bias[None, :]


if __name__ == "__main__":
    # Small shapes consistent with the module: batch=8, in_features=128, out_features=64.
    batch, in_features, out_features = 8, 128, 64

    key = jax.random.PRNGKey(0)
    k_x, k_w, k_b, k_la = jax.random.split(key, 4)

    # Deterministic parameter init mirroring BaseL0Layer.init_parameters(wmode='fan_out'):
    #   kaiming_normal_(fan_out) -> std = sqrt(2 / out_features); then weight /= (1 - droprate_init)
    initial_sigmoid = 1.0 - DROPRATE_INIT
    w_std = math.sqrt(2.0 / out_features)
    weight = (jax.random.normal(k_w, (out_features, in_features), jnp.float32)
              * w_std) / initial_sigmoid
    bias = jax.random.normal(k_b, (out_features,), jnp.float32) * 0.01
    gate_mean_init = math.log((1.0 - DROPRATE_INIT) / DROPRATE_INIT)  # = 0.0
    weight_log_alpha = (gate_mean_init
                        + jax.random.normal(k_la, (in_features,), jnp.float32) * 0.01)

    x = jax.random.normal(k_x, (batch, in_features), jnp.float32)

    out = l0_linear_forward(x, weight, weight_log_alpha, bias)
    out = jax.block_until_ready(out)

    ref = reference_forward(x, weight, weight_log_alpha, bias)
    assert out.shape == (batch, out_features)
    assert jnp.allclose(out, ref, atol=1e-4, rtol=1e-4), "mismatch vs reference"

    print("KERNEL_OK")
</pallas_src>

<mosaic_0001>
module attributes {stable_mosaic.version = 11 : i64} {
  func.func @l0_linear_kernel(%arg0: i32, %arg1: i32, %arg2: i32, %arg3: memref<8x128xf32, #tpu.memory_space<vmem>>, %arg4: memref<128x128xf32, #tpu.memory_space<vmem>>, %arg5: memref<1x128xf32, #tpu.memory_space<vmem>>, %arg6: memref<1x128xf32, #tpu.memory_space<vmem>>, %arg7: memref<8x128xf32, #tpu.memory_space<vmem>>, %arg8: memref<8x128xf32, #tpu.memory_space<vmem>>) attributes {dimension_semantics = [#tpu.dimension_semantics<parallel>, #tpu.dimension_semantics<parallel>, #tpu.dimension_semantics<arbitrary>], iteration_bounds = array<i64: 1, 1, 1>, scalar_prefetch = 0 : i64, scratch_operands = 1 : i64, tpu.core_type = #tpu.core_type<tc>, window_params = [{transform_indices = @transform_0, window_bounds = array<i64: 8, 128>}, {transform_indices = @transform_1, window_bounds = array<i64: 128, 128>}, {transform_indices = @transform_2, window_bounds = array<i64: 1, 128>}, {transform_indices = @transform_3, window_bounds = array<i64: 1, 128>}, {transform_indices = @transform_4, window_bounds = array<i64: 8, 128>}]} {
    %c0_i32 = arith.constant 0 : i32
    %0 = arith.cmpi eq, %arg2, %c0_i32 : i32
    %1 = arith.extui %0 : i1 to i32
    %c0_i32_0 = arith.constant 0 : i32
    %2 = arith.cmpi ne, %1, %c0_i32_0 : i32
    scf.if %2 {
      %cst_18 = arith.constant 0.000000e+00 : f32
      %30 = vector.broadcast %cst_18 : f32 to vector<8x128xf32>
      %c0_19 = arith.constant 0 : index
      %c0_20 = arith.constant 0 : index
      %31 = vector.load %arg8[%c0_19, %c0_20] : memref<8x128xf32, #tpu.memory_space<vmem>>, vector<8x128xf32>
      tpu.vector_store %arg8[%c0_19, %c0_20], %30 {strides = array<i32>} : memref<8x128xf32, #tpu.memory_space<vmem>>, vector<8x128xf32>,
    } else {
    }
    %c0 = arith.constant 0 : index
    %c0_1 = arith.constant 0 : index
    %3 = vector.load %arg5[%c0, %c0_1] : memref<1x128xf32, #tpu.memory_space<vmem>>, vector<1x128xf32>
    %cst = arith.constant 1.500000e+00 : f32
    %4 = vector.broadcast %cst : f32 to vector<1x128xf32>
    %5 = arith.mulf %3, %4 : vector<1x128xf32>
    %6 = arith.negf %5 : vector<1x128xf32>
    %7 = math.exp %6 : vector<1x128xf32>
    %cst_2 = arith.constant 1.000000e+00 : f32
    %8 = vector.broadcast %cst_2 : f32 to vector<1x128xf32>
    %9 = arith.addf %8, %7 : vector<1x128xf32>
    %10 = arith.divf %8, %9 : vector<1x128xf32>
    %cst_3 = arith.constant 1.200000e+00 : f32
    %11 = vector.broadcast %cst_3 : f32 to vector<1x128xf32>
    %12 = arith.mulf %10, %11 : vector<1x128xf32>
    %cst_4 = arith.constant -1.000000e-01 : f32
    %13 = vector.broadcast %cst_4 : f32 to vector<1x128xf32>
    %14 = arith.addf %12, %13 : vector<1x128xf32>
    %cst_5 = arith.constant 0.000000e+00 : f32
    %cst_6 = arith.constant 1.000000e+00 : f32
    %15 = vector.broadcast %cst_5 : f32 to vector<1x128xf32>
    %16 = arith.maximumf %15, %14 : vector<1x128xf32>
    %17 = vector.broadcast %cst_6 : f32 to vector<1x128xf32>
    %18 = arith.minimumf %17, %16 : vector<1x128xf32>
    %c0_7 = arith.constant 0 : index
    %c0_8 = arith.constant 0 : index
    %19 = vector.load %arg3[%c0_7, %c0_8] : memref<8x128xf32, #tpu.memory_space<vmem>>, vector<8x128xf32>
    %20 = vector.broadcast %18 : vector<1x128xf32> to vector<8x128xf32>
    %21 = arith.mulf %19, %20 : vector<8x128xf32>
    %c0_9 = arith.constant 0 : index
    %c0_10 = arith.constant 0 : index
    %22 = vector.load %arg8[%c0_9, %c0_10] : memref<8x128xf32, #tpu.memory_space<vmem>>, vector<8x128xf32>
    %c0_11 = arith.constant 0 : index
    %c0_12 = arith.constant 0 : index
    %23 = vector.load %arg4[%c0_11, %c0_12] : memref<128x128xf32, #tpu.memory_space<vmem>>, vector<128x128xf32>
    %cst_13 = arith.constant dense<0.000000e+00> : vector<8x128xf32>
    %24 = tpu.matmul %21, %23, %cst_13 {dimension_numbers = #tpu.dot_dimension_numbers<[1], [1], [0], [0], [0, 0, 1, 0], [], []>} : vector<8x128xf32>, vector<128x128xf32>, vector<8x128xf32> -> vector<8x128xf32>
    %25 = arith.addf %22, %24 : vector<8x128xf32>
    %c0_14 = arith.constant 0 : index
    %c0_15 = arith.constant 0 : index
    %26 = vector.load %arg8[%c0_14, %c0_15] : memref<8x128xf32, #tpu.memory_space<vmem>>, vector<8x128xf32>
    tpu.vector_store %arg8[%c0_14, %c0_15], %25 {strides = array<i32>} : memref<8x128xf32, #tpu.memory_space<vmem>>, vector<8x128xf32>,
    %c0_i32_16 = arith.constant 0 : i32
    %27 = arith.cmpi eq, %arg2, %c0_i32_16 : i32
    %28 = arith.extui %27 : i1 to i32
    %c0_i32_17 = arith.constant 0 : i32
    %29 = arith.cmpi ne, %28, %c0_i32_17 : i32
    scf.if %29 {
      %c0_18 = arith.constant 0 : index
      %c0_19 = arith.constant 0 : index
      %30 = vector.load %arg8[%c0_18, %c0_19] : memref<8x128xf32, #tpu.memory_space<vmem>>, vector<8x128xf32>
      %c0_20 = arith.constant 0 : index
      %c0_21 = arith.constant 0 : index
      %31 = vector.load %arg6[%c0_20, %c0_21] : memref<1x128xf32, #tpu.memory_space<vmem>>, vector<1x128xf32>
      %32 = vector.broadcast %31 : vector<1x128xf32> to vector<8x128xf32>
      %33 = arith.addf %30, %32 : vector<8x128xf32>
      %c0_22 = arith.constant 0 : index
      %c0_23 = arith.constant 0 : index
      %34 = vector.load %arg7[%c0_22, %c0_23] : memref<8x128xf32, #tpu.memory_space<vmem>>, vector<8x128xf32>
      tpu.vector_store %arg7[%c0_22, %c0_23], %33 {strides = array<i32>} : memref<8x128xf32, #tpu.memory_space<vmem>>, vector<8x128xf32>,
    } else {
    }
    return
  }
  func.func @transform_0(%arg0: i32, %arg1: i32, %arg2: i32) -> (i32, i32) {
    %c0_i32 = arith.constant 0 : i32
    return %arg0, %arg2 : i32, i32
  }
  func.func @transform_1(%arg0: i32, %arg1: i32, %arg2: i32) -> (i32, i32) {
    %c0_i32 = arith.constant 0 : i32
    return %arg1, %arg2 : i32, i32
  }
  func.func @transform_2(%arg0: i32, %arg1: i32, %arg2: i32) -> (i32, i32) {
    %c0_i32 = arith.constant 0 : i32
    %c0_i32_0 = arith.constant 0 : i32
    return %c0_i32, %arg2 : i32, i32
  }
  func.func @transform_3(%arg0: i32, %arg1: i32, %arg2: i32) -> (i32, i32) {
    %c0_i32 = arith.constant 0 : i32
    %c0_i32_0 = arith.constant 0 : i32
    return %c0_i32, %arg1 : i32, i32
  }
  func.func @transform_4(%arg0: i32, %arg1: i32, %arg2: i32) -> (i32, i32) {
    %c0_i32 = arith.constant 0 : i32
    return %arg0, %arg1 : i32, i32
  }
}

</mosaic_0001>

<bundles_post_ra>
// kernel: tpu_custom_call.1
= control target key start
LH: loop header
LB: loop body
LE: loop exit
PB: predicated region body
PF: predicated region fallthrough
CT: control target
= control target key end

     0   :  { %9 = vsyncpa [#allocation4], 0  ;;  %s382_s0 = inlined_call_operand.hbm [shape: f32[8,128], index: 0, kind: input, shape index: {}]   ;;  %s383_s1 = inlined_call_operand.hbm [shape: f32[128,128], index: 1, kind: input, shape index: {}]   ;;  %s384_s2 = inlined_call_operand.vmem [shape: f32[1,128], index: 2, kind: input, shape index: {}]   ;;  %s385_s3 = inlined_call_operand.vmem [shape: f32[1,128], index: 3, kind: input, shape index: {}]   ;;  %s386_s4 = inlined_call_operand.hbm [shape: f32[8,128], index: 4, kind: output, shape index: {}]  }
   0x1   :  { %10 = vsyncpa [#allocation7], 0 }
   0x2   :  { %11 = vsyncpa [#allocation5], 0  ;;  %s318_s15 = smov [#allocation3]   ;;  %s319_s17 = smov [#allocation6]  }
   0x3   :  { %s18_s16 = sshll.u32 %s318_s15, 4  ;;  %s27_s18 = sshll.u32 %s319_s17, 4  ;;  %s19_s16 = int_to_ptr.vmem [resolvable:$true] %s18_s16  ;;  %s28_s18 = int_to_ptr.vmem [resolvable:$true] %s27_s18 }
   0x4   :  { %s260_s19 = scalar_lea.vmem %s19_s16, 128  ;;  %p265_p1 = scmp.lt.s32.totalorder %s19_s16, %s19_s16 }
   0x5   :  { %p261_p0 = scmp.ne.s32.totalorder %s19_s16, %s260_s19  ;;  %p266_p2 = scmp.lt.s32.totalorder %s260_s19, %s260_s19 }
   0x7   :  { %p267_p3 = por %p266_p2, %p265_p1 }
   0x9   :  { %p268_p4 = pnand %p267_p3, %p261_p0 }
   0xb   :  { %271 = shalt.err (!%p268_p4)
}
   0xc   :  { %21 = dma.hbm_to_vmem [thread:$0]  %s382_s0, 128, %s19_s16, [#allocation4]  }
   0xd   :  { %s280_s22 = scalar_lea.vmem %s28_s18, 2048  ;;  %p285_p6 = scmp.lt.s32.totalorder %s28_s18, %s28_s18 }
   0xe   :  { %p281_p5 = scmp.ne.s32.totalorder %s28_s18, %s280_s22  ;;  %p286_p7 = scmp.lt.s32.totalorder %s280_s22, %s280_s22 }
  0x10   :  { %p287_p8 = por %p286_p7, %p285_p6 }
  0x12   :  { %p288_p9 = pnand %p287_p8, %p281_p5 }
  0x14   :  { %291 = shalt.err (!%p288_p9)
}
  0x15   :  { %s320_s23 = smov 128   ;;  %s321_s24 = smov 8  }
  0x16   :  { %33 = dma.hbm_to_vmem [thread:$0]  %s383_s1, 2048, %s28_s18, [#allocation7], %s320_s23, %s320_s23, %s321_s24  }
  0x17   :  { %312 = dma.done.wait [#allocation4], 128  }
  0x18   :  { %313 = vsyncadd [#allocation4], 4294967168 }
  0x19   :  { %314 = dma.done.wait [#allocation7], 2048  }
  0x1a   :  { %315 = vsyncadd [#allocation7], 4294965248  ;;  %v322_v0 = vmov 0.0   ;;  %vm323_vm0 = vmmov 0   ;;  %v85_v1 = vld [vmem:[#allocation6 + $0x78] sm:$0xff]  ;;  %v84_v2 = vld [vmem:[#allocation6 + $0x70] sm:$0xff]  ;;  %v63_v21 = vlaneseq }
  0x1b   :  { %206 = vmatprep.subr.mxu0 %v322_v0  ;;  %238 = vmatprep.mubr.msk.f32.mxu0 %vm323_vm0, %v322_v0  ;;  %v49_v3 = vld [vmem:[%s384_s2] sm:$0x1]  ;;  %v83_v4 = vld [vmem:[#allocation6 + $0x68] sm:$0xff]  ;;  %v82_v7 = vld [vmem:[#allocation6 + $0x60] sm:$0xff]  ;;  %s324_s28 = smov [#allocation8]  }
  0x1c   :  { %207 = vmatpush3.xpose.msra.mxu0 %v85_v1  ;;  %v187_v5 = vmul.f32 -1.5, %v49_v3  ;;  %v81_v8 = vld [vmem:[#allocation6 + $0x58] sm:$0xff]  ;;  %v80_v9 = vld [vmem:[#allocation6 + $0x50] sm:$0xff]  ;;  %v79_v10 = vld [vmem:[#allocation6 + $0x48] sm:$0xff]  ;;  %v64_v24 = vshrl.u32 %v63_v21, 7  ;;  %s177_s29 = sshll.u32 %s324_s28, 4  ;;  %s178_s29 = int_to_ptr.vmem [resolvable:$true] %s177_s29 }
  0x1d   :  { %208 = vmatprep.subr.mxu0 %v322_v0  ;;  %v78_v13 = vld [vmem:[#allocation6 + $0x40] sm:$0xff]  ;;  %v77_v14 = vld [vmem:[#allocation6 + $0x38] sm:$0xff]  ;;  %v76_v15 = vld [vmem:[#allocation6 + $0x30] sm:$0xff]  ;;  %s292_s30 = scalar_lea.vmem %s178_s29, 128  ;;  %p297_p11 = scmp.lt.s32.totalorder %s178_s29, %s178_s29 }
  0x1e   :  { %v52_v6 = vmul.f32 1.442695, %v187_v5  ;;  %v75_v16 = vld [vmem:[#allocation6 + $0x28] sm:$0xff]  ;;  %v74_v19 = vld [vmem:[#allocation6 + $0x20] sm:$0xff]  ;;  %v73_v22 = vld [vmem:[#allocation6 + $0x18] sm:$0xff]  ;;  %v65_v27 = vsub.s32 0, %v64_v24  ;;  %p293_p10 = scmp.ne.s32.totalorder %s178_s29, %s292_s30  ;;  %p298_p12 = scmp.lt.s32.totalorder %s292_s30, %s292_s30 }
  0x1f   :  { %v72_v25 = vld [vmem:[#allocation6 + $0x10] sm:$0xff]  ;;  %v71_v28 = vld [vmem:[#allocation6 + $0x8] sm:$0xff]  ;;  %v61_v30 = vld [vmem:[#allocation3] sm:$0xff] }
  0x20   :  { %209 = vmatpush3.xpose.msra.mxu0 %v84_v2  ;;  %248 = vpow2.f32 %v52_v6  ;;  %v70_v31 = vld [vmem:[#allocation6] sm:$0xff]  ;;  %v188_v33 = vld [vmem:[%s385_s3] ss:$0 sm:$0xff]  ;;  %p299_p13 = por %p298_p12, %p297_p11 }
  0x21   :  { %210 = vmatprep.subr.mxu0 %v322_v0 }
  0x22   :  { %p300_p0 = pnand %p299_p13, %p293_p10 }
  0x24   :  { %211 = vmatpush3.xpose.msra.mxu0 %v83_v4 }
  0x25   :  { %212 = vmatprep.subr.mxu0 %v322_v0 }
  0x28   :  { %213 = vmatpush3.xpose.msra.mxu0 %v82_v7 }
  0x29   :  { %214 = vmatprep.subr.mxu0 %v322_v0 }
  0x2c   :  { %215 = vmatpush3.xpose.msra.mxu0 %v81_v8 }
  0x2d   :  { %216 = vmatprep.subr.mxu0 %v322_v0  ;;  %v249_v11 = vpop.eup %248 }
  0x2e   :  { %v54_v12 = vadd.f32 1.0, %v249_v11 }
  0x30   :  { %217 = vmatpush3.xpose.msra.mxu0 %v80_v9  ;;  %250 = vrcp.f32 %v54_v12 }
  0x31   :  { %218 = vmatprep.subr.mxu0 %v322_v0 }
  0x34   :  { %219 = vmatpush3.xpose.msra.mxu0 %v79_v10 }
  0x35   :  { %220 = vmatprep.subr.mxu0 %v322_v0 }
  0x38   :  { %221 = vmatpush3.xpose.msra.mxu0 %v78_v13 }
  0x39   :  { %222 = vmatprep.subr.mxu0 %v322_v0 }
  0x3c   :  { %223 = vmatpush3.xpose.msra.mxu0 %v77_v14 }
  0x3d   :  { %224 = vmatprep.subr.mxu0 %v322_v0  ;;  %v251_v17 = vpop.eup %250 }
  0x3e   :  { %v57_v18 = vmul.f32 1.2, %v251_v17 }
  0x40   :  { %225 = vmatpush3.xpose.msra.mxu0 %v76_v15  ;;  %v58_v20 = vadd.f32 -0.1, %v57_v18 }
  0x41   :  { %226 = vmatprep.subr.mxu0 %v322_v0 }
  0x42   :  { %v59_v23 = vmax.f32 %v58_v20, 0.0 }
  0x44   :  { %227 = vmatpush3.xpose.msra.mxu0 %v75_v16  ;;  %v60_v26 = vmin.f32 %v59_v23, 1.0 }
  0x45   :  { %228 = vmatprep.subr.mxu0 %v322_v0 }
  0x46   :  { %v66_v29 = vrot.slane %v60_v26, %v65_v27 }
  0x48   :  { %229 = vmatpush3.xpose.msra.mxu0 %v74_v19  ;;  %v68_v32 = vmul.f32 %v66_v29, %v61_v30 }
  0x49   :  { %230 = vmatprep.subr.mxu0 %v322_v0 }
  0x4c   :  { %231 = vmatpush3.xpose.msra.mxu0 %v73_v22 }
  0x4d   :  { %232 = vmatprep.subr.mxu0 %v322_v0 }
  0x50   :  { %233 = vmatpush3.xpose.msra.mxu0 %v72_v25 }
  0x51   :  { %234 = vmatprep.subr.mxu0 %v322_v0 }
  0x54   :  { %235 = vmatpush3.xpose.msra.mxu0 %v71_v28 }
  0x55   :  { %236 = vmatprep.subr.mxu0 %v322_v0 }
  0x58   :  { %237 = vmatpush3.xpose.msra.mxu0 %v70_v31 }
  0x5b   :  { %239 = vmatmul.mubr.f32.vlgmr.msra.gmra.mxu0 %v68_v32 }
 0x11b   :  { %v152_v34 = vpop.f32.mrf.mxu0 }
 0x11c   :  { %v169_v35 = vadd.f32 %v188_v33, %v152_v34 }
 0x11d   :  { %v240_v36 = vpop.f32.mrf.mxu0 }
 0x11e   :  { %170 = vst [vmem:[#allocation8] sm:$0xff] %v169_v35 }
 0x11f   :  { %303 = shalt.err (!%p300_p0)
}
 0x120   :  { %180 = dma.vmem_to_hbm [thread:$0]  %s178_s29, 128, %s386_s4, [#allocation5]  }
 0x121   :  { %316 = dma.done.wait [#allocation5], 128  }
 0x122   :  { %317 = vsyncadd [#allocation5], 4294967168 }
 0x123   :  { %184 = vsyncpa [#allocation4], 1 }
 0x124   :  { %185 = vsyncpa [#allocation7], 1 }
 0x125   :  { %186 = vsyncpa [#allocation5], 1 }

</bundles_post_ra>
